<compile_context>
chip_gen: v5e
topology: v5e:2x2
jax: 0.10.0
libtpu: 0.0.40
codegen_flags: <defaults>
</compile_context>

<pallas_src>
import math

import jax
import jax.numpy as jnp
from jax.experimental import pallas as pl
from jax.experimental.pallas import tpu as pltpu


def _ffm_attention_kernel(x_ref, wv_ref, wf_ref, o_ref):
    # x_ref : (Bb, S, Db)   wv_ref : (Db, Di)   wf_ref : (Di, Db)
    # o_ref : (Bb, S, Db)
    x = x_ref[...]
    # Uniform attention == per-batch mean over the sequence.  Accumulate the
    # mean in f32 (cheap VPU/XLU work), then feed the MXU operands in the
    # weights' native dtype so bf16 weights keep the 2x bf16 MXU rate.
    x_mean = jnp.mean(x.astype(jnp.float32), axis=1)              # [Bb, Db]
    v_mean = jnp.dot(x_mean.astype(wv_ref.dtype), wv_ref[...],
                     preferred_element_type=jnp.float32)          # [Bb, Di]
    out_row = jnp.dot(v_mean.astype(wf_ref.dtype), wf_ref[...],
                      preferred_element_type=jnp.float32)         # [Bb, Db]
    # Every sequence position gets the same row (uniform attention weights).
    o_ref[...] = jnp.broadcast_to(out_row[:, None, :],
                                  o_ref.shape).astype(o_ref.dtype)


def _pick_batch_block(B, S, Db, itemsize):
    """Pick the per-grid-step batch block.

    Prefer the smallest divisor of B giving >=128 sublane rows per step
    (amortizes per-step overhead, keeps grid steps for megacore), while
    keeping double-buffered in+out blocks well under the scoped VMEM default
    on every generation (including v7x's 64 MiB physical / 32 MiB scoped).
    """
    budget = 8 * 1024 * 1024  # in + out, double buffered
    divisors = [d for d in range(1, B + 1) if B % d == 0]
    fitting = [d for d in divisors if 4 * d * S * Db * itemsize <= budget]
    if not fitting:
        return 1
    dense = [d for d in fitting if d * S >= 128]
    return dense[0] if dense else fitting[-1]


def feature_fusion_attention(inputs_embeds, structure_features,
                             wq, wk, wv, wf, num_heads):
    """Pallas forward pass of FeatureFusionModuleAttention.

    structure_features / wq / wk are accepted for API parity but never DMA'd:
    with identical keys the softmax is exactly uniform, so the output equals
    mean_seq(x) @ Wv @ Wf broadcast over the sequence.  (If Q/K/structure
    inputs contained non-finite values the PyTorch module would propagate
    NaNs; this kernel assumes finite inputs.)
    """
    del structure_features, wq, wk  # mathematically dead for the forward pass
    B, S, Db = inputs_embeds.shape
    Di = wv.shape[1]
    assert wv.shape == (Db, Di), "Wv must be [backbone_hidden, intermediate]"
    assert wf.shape == (Di, Db), "Wf must be [intermediate, backbone_hidden]"
    assert Di % num_heads == 0

    Bb = _pick_batch_block(B, S, Db, inputs_embeds.dtype.itemsize)
    grid = (B // Bb,)

    # TODO(synk): output last dim Db (<128 here) forces masked stores; padding
    # it to 128 lanes would change the module's output shape, so it is kept.
    return pl.pallas_call(
        _ffm_attention_kernel,
        out_shape=jax.ShapeDtypeStruct((B, S, Db), inputs_embeds.dtype),
        grid=grid,
        in_specs=[
            pl.BlockSpec((Bb, S, Db), lambda b: (b, 0, 0)),   # inputs_embeds
            pl.BlockSpec((Db, Di), lambda b: (0, 0)),         # Wv   (in, out)
            pl.BlockSpec((Di, Db), lambda b: (0, 0)),         # Wfinal (in, out)
        ],
        out_specs=pl.BlockSpec((Bb, S, Db), lambda b: (b, 0, 0)),
        compiler_params=pltpu.CompilerParams(
            dimension_semantics=("parallel",)),
    )(inputs_embeds, wv, wf)


def reference(x, sf, wq, wk, wv, wf, num_heads):
    """Pure-JAX mirror of the PyTorch forward pass (full attention math)."""
    B, S, Db = x.shape
    Di = wq.shape[1]
    d = Di // num_heads
    q = (x @ wq).reshape(B, S, num_heads, d).transpose(0, 2, 1, 3)
    sfr = jnp.repeat(sf[:, None, :], S, axis=1)
    k = (sfr @ wk).reshape(B, S, num_heads, d).transpose(0, 2, 1, 3)
    v = (x @ wv).reshape(B, S, num_heads, d).transpose(0, 2, 1, 3)
    scores = jnp.einsum('bhqd,bhkd->bhqk', q, k) / math.sqrt(d)
    probs = jax.nn.softmax(scores, axis=-1)
    att = jnp.einsum('bhqk,bhkd->bhqd', probs, v)
    att = att.transpose(0, 2, 1, 3).reshape(B, S, Di)
    return att @ wf


if __name__ == "__main__":
    # Small shapes consistent with the module's forward pass.
    B, S = 2, 8
    backbone_hidden = 32
    gnn_hidden = 16
    intermediate_hidden = 32
    num_heads = 4

    key = jax.random.PRNGKey(0)
    k0, k1, k2, k3, k4, k5 = jax.random.split(key, 6)

    inputs_embeds = jax.random.normal(k0, (B, S, backbone_hidden), jnp.float32)
    structure_features = jax.random.normal(k1, (B, gnn_hidden), jnp.float32)

    # PyTorch Linear stores [out, in]; we keep [in, out] so kernels do x @ W.
    def init_w(k, fan_in, fan_out):
        bound = 1.0 / math.sqrt(fan_in)
        return jax.random.uniform(k, (fan_in, fan_out), jnp.float32, -bound, bound)

    wq = init_w(k2, backbone_hidden, intermediate_hidden)
    wk = init_w(k3, gnn_hidden, intermediate_hidden)
    wv = init_w(k4, backbone_hidden, intermediate_hidden)
    wf = init_w(k5, intermediate_hidden, backbone_hidden)

    out = feature_fusion_attention(inputs_embeds, structure_features,
                                   wq, wk, wv, wf, num_heads)
    out = jax.block_until_ready(out)

    ref = reference(inputs_embeds, structure_features, wq, wk, wv, wf, num_heads)
    assert out.shape == (B, S, backbone_hidden)
    assert jnp.allclose(out, ref, rtol=1e-5, atol=1e-5), "mismatch vs JAX reference"

    print("KERNEL_OK")
</pallas_src>

<mosaic_0001>
module attributes {stable_mosaic.version = 11 : i64} {
  func.func @_ffm_attention_kernel(%arg0: i32, %arg1: memref<2x8x32xf32, #tpu.memory_space<vmem>>, %arg2: memref<32x32xf32, #tpu.memory_space<vmem>>, %arg3: memref<32x32xf32, #tpu.memory_space<vmem>>, %arg4: memref<2x8x32xf32, #tpu.memory_space<vmem>>) attributes {dimension_semantics = [#tpu.dimension_semantics<parallel>], iteration_bounds = array<i64: 1>, scalar_prefetch = 0 : i64, scratch_operands = 0 : i64, tpu.core_type = #tpu.core_type<tc>, window_params = [{transform_indices = @transform_0, window_bounds = array<i64: 2, 8, 32>}, {pipeline_mode = #tpu.pipeline_mode<synchronous>, transform_indices = @transform_1, window_bounds = array<i64: 32, 32>}, {pipeline_mode = #tpu.pipeline_mode<synchronous>, transform_indices = @transform_2, window_bounds = array<i64: 32, 32>}, {transform_indices = @transform_3, window_bounds = array<i64: 2, 8, 32>}]} {
    %c0 = arith.constant 0 : index
    %c0_0 = arith.constant 0 : index
    %c0_1 = arith.constant 0 : index
    %0 = vector.load %arg1[%c0, %c0_0, %c0_1] : memref<2x8x32xf32, #tpu.memory_space<vmem>>, vector<2x8x32xf32>
    %cst = arith.constant dense<0.000000e+00> : vector<2x32xf32>
    %1 = vector.multi_reduction <add>, %0, %cst [1] : vector<2x8x32xf32> to vector<2x32xf32>
    %cst_2 = arith.constant 8.000000e+00 : f32
    %2 = vector.broadcast %cst_2 : f32 to vector<2x32xf32>
    %3 = arith.divf %1, %2 : vector<2x32xf32>
    %c0_3 = arith.constant 0 : index
    %c0_4 = arith.constant 0 : index
    %4 = vector.load %arg2[%c0_3, %c0_4] : memref<32x32xf32, #tpu.memory_space<vmem>>, vector<32x32xf32>
    %cst_5 = arith.constant dense<0.000000e+00> : vector<2x32xf32>
    %5 = tpu.matmul %3, %4, %cst_5 {dimension_numbers = #tpu.dot_dimension_numbers<[1], [0], [0], [1], [0, 0, 1, 1], [], []>} : vector<2x32xf32>, vector<32x32xf32>, vector<2x32xf32> -> vector<2x32xf32>
    %c0_6 = arith.constant 0 : index
    %c0_7 = arith.constant 0 : index
    %6 = vector.load %arg3[%c0_6, %c0_7] : memref<32x32xf32, #tpu.memory_space<vmem>>, vector<32x32xf32>
    %cst_8 = arith.constant dense<0.000000e+00> : vector<2x32xf32>
    %7 = tpu.matmul %5, %6, %cst_8 {dimension_numbers = #tpu.dot_dimension_numbers<[1], [0], [0], [1], [0, 0, 1, 1], [], []>} : vector<2x32xf32>, vector<32x32xf32>, vector<2x32xf32> -> vector<2x32xf32>
    %8 = vector.shape_cast %7 : vector<2x32xf32> to vector<2x1x32xf32>
    %9 = vector.shape_cast %8 : vector<2x1x32xf32> to vector<2x1x32xf32>
    %10 = vector.broadcast %9 : vector<2x1x32xf32> to vector<2x8x32xf32>
    %c0_9 = arith.constant 0 : index
    %c0_10 = arith.constant 0 : index
    %c0_11 = arith.constant 0 : index
    %11 = vector.load %arg4[%c0_9, %c0_10, %c0_11] : memref<2x8x32xf32, #tpu.memory_space<vmem>>, vector<2x8x32xf32>
    tpu.vector_store %arg4[%c0_9, %c0_10, %c0_11], %10 {strides = array<i32>} : memref<2x8x32xf32, #tpu.memory_space<vmem>>, vector<2x8x32xf32>,
    return
  }
  func.func @transform_0(%arg0: i32) -> (i32, i32, i32) {
    %c0_i32 = arith.constant 0 : i32
    %c0_i32_0 = arith.constant 0 : i32
    %c0_i32_1 = arith.constant 0 : i32
    return %arg0, %c0_i32, %c0_i32_0 : i32, i32, i32
  }
  func.func @transform_1(%arg0: i32) -> (i32, i32) {
    %c0_i32 = arith.constant 0 : i32
    %c0_i32_0 = arith.constant 0 : i32
    %c0_i32_1 = arith.constant 0 : i32
    return %c0_i32, %c0_i32_0 : i32, i32
  }
  func.func @transform_2(%arg0: i32) -> (i32, i32) {
    %c0_i32 = arith.constant 0 : i32
    %c0_i32_0 = arith.constant 0 : i32
    %c0_i32_1 = arith.constant 0 : i32
    return %c0_i32, %c0_i32_0 : i32, i32
  }
  func.func @transform_3(%arg0: i32) -> (i32, i32, i32) {
    %c0_i32 = arith.constant 0 : i32
    %c0_i32_0 = arith.constant 0 : i32
    %c0_i32_1 = arith.constant 0 : i32
    return %arg0, %c0_i32, %c0_i32_0 : i32, i32, i32
  }
}

</mosaic_0001>

<bundles_post_ra>
// kernel: tpu_custom_call.1
= control target key start
LH: loop header
LB: loop body
LE: loop exit
PB: predicated region body
PF: predicated region fallthrough
CT: control target
= control target key end

     0   :  { %8 = vsyncpa [#allocation3], 0  ;;  %s343_s0 = inlined_call_operand.hbm [shape: f32[2,8,32], index: 0, kind: input, shape index: {}]   ;;  %s344_s1 = inlined_call_operand.hbm [shape: f32[32,32], index: 1, kind: input, shape index: {}]   ;;  %s345_s2 = inlined_call_operand.hbm [shape: f32[32,32], index: 2, kind: input, shape index: {}]   ;;  %s346_s3 = inlined_call_operand.hbm [shape: f32[2,8,32], index: 3, kind: output, shape index: {}]  }
   0x1   :  { %9 = vsyncpa [#allocation6], 0 }
   0x2   :  { %10 = vsyncpa [#allocation4], 0  ;;  %s28_s14 = sshll.u32 %s344_s1, 4  ;;  %s286_s15 = smov [#allocation5]   ;;  %s29_s14 = int_to_ptr.hbm [resolvable:$true] %s28_s14 }
   0x3   :  { %s30_s16 = sshll.u32 %s286_s15, 4  ;;  %s15_s19 = sshll.u32 %s343_s0, 4  ;;  %s31_s16 = int_to_ptr.vmem [resolvable:$true] %s30_s16  ;;  %s16_s19 = int_to_ptr.hbm [resolvable:$true] %s15_s19 }
   0x4   :  { %s287_s20 = smov 128   ;;  %s288_s21 = smov 8  }
   0x5   :  { %36 = dma.hbm_to_vmem [thread:$0]  %s29_s14, 512, %s31_s16, [#allocation6], %s287_s20, %s287_s20, %s288_s21  }
   0x6   :  { %s289_s22 = smov [#allocation2]   ;;  %s41_s1 = sshll.u32 %s345_s2, 4  ;;  %s42_s1 = int_to_ptr.hbm [resolvable:$true] %s41_s1 }
   0x7   :  { %s17_s23 = sshll.u32 %s289_s22, 4  ;;  %s290_s0 = smov [#allocation7]   ;;  %s18_s23 = int_to_ptr.vmem [resolvable:$true] %s17_s23 }
   0x8   :  { %23 = dma.hbm_to_vmem [thread:$0]  %s16_s19, 256, %s18_s23, [#allocation3], %s287_s20, %s287_s20, %s288_s21  }
   0x9   :  { %s43_s26 = sshll.u32 %s290_s0, 4  ;;  %s44_s26 = int_to_ptr.vmem [resolvable:$true] %s43_s26 }
   0xa   :  { %49 = dma.hbm_to_vmem [thread:$0]  %s42_s1, 512, %s44_s26, [#allocation6], %s287_s20, %s287_s20, %s288_s21  }
   0xb   :  { %280 = dma.done.wait [#allocation3], 256  }
   0xc   :  { %281 = vsyncadd [#allocation3], 4294967040 }
   0xd   :  { %282 = dma.done.wait [#allocation6], 1024  }
   0xe   :  { %283 = vsyncadd [#allocation6], 4294966272  ;;  %v291_v0 = vmov 8.0   ;;  %vm64_vm0 = vcmask 261120   ;;  %v91_v2 = vld [vmem:[#allocation5 + $0x18] sm:$0xff]  ;;  %v90_v3 = vld [vmem:[#allocation5 + $0x10] sm:$0xff] }
   0xf   :  { %182 = vrcp.f32 %v291_v0  ;;  %110 = vmatpush.msra.mxu0 %v91_v2  ;;  %v62_v4 = vld [vmem:[#allocation2] sm:$0xff]  ;;  %v63_v5 = vld [vmem:[#allocation2 + $0x8] sm:$0xff]  ;;  %v89_v7 = vld [vmem:[#allocation5 + $0x8] sm:$0xff]  ;;  %vm94_vm2 = vcmask 1041409   ;;  %s292_s2 = smov [#allocation8]   ;;  %s159_s30 = sshll.u32 %s346_s3, 4  ;;  %s160_s30 = int_to_ptr.hbm [resolvable:$true] %s159_s30 }
  0x10   :  { %v65_v8 = vsel %vm64_vm0, %v62_v4, 0.0  ;;  %v72_v9 = vsel %vm64_vm0, %v63_v5, 0.0  ;;  %v121_v10 = vld [vmem:[#allocation7 + $0x18] sm:$0xff]  ;;  %v120_v11 = vld [vmem:[#allocation7 + $0x10] sm:$0xff]  ;;  %v88_v15 = vld [vmem:[#allocation5] sm:$0xff]  ;;  %s157_s27 = sshll.u32 %s292_s2, 4  ;;  %s158_s27 = int_to_ptr.vmem [resolvable:$true] %s157_s27 }
  0x11   :  { %111 = vmatpush.msra.mxu0 %v90_v3  ;;  %v66_v12 = vrot.slane %v65_v8, 4  ;;  %v73_v13 = vrot.slane %v72_v9, 4  ;;  %137 = vmatpush.msra.mxu1 %v121_v10  ;;  %v119_v16 = vld [vmem:[#allocation7 + $0x8] sm:$0xff]  ;;  %v118_v33 = vld [vmem:[#allocation7] sm:$0xff] }
  0x13   :  { %112 = vmatpush.msra.mxu0 %v89_v7  ;;  %v67_v17 = vadd.f32 %v66_v12, %v65_v8  ;;  %v74_v18 = vadd.f32 %v73_v13, %v72_v9  ;;  %138 = vmatpush.msra.mxu1 %v120_v11 }
  0x15   :  { %v183_v1 = vpop.eup %182  ;;  %113 = vmatpush.msra.mxu0 %v88_v15  ;;  %v68_v20 = vrot.slane %v67_v17, 2  ;;  %v75_v21 = vrot.slane %v74_v18, 2  ;;  %139 = vmatpush.msra.mxu1 %v119_v16 }
  0x16   :  { %v80_v6 = vmul.f32 8.0, %v183_v1  ;;  %vm84_vm1 = vweird.f32 %v183_v1 }
  0x17   :  { %v69_v23 = vadd.f32 %v68_v20, %v67_v17  ;;  %v76_v24 = vadd.f32 %v75_v21, %v74_v18  ;;  %140 = vmatpush.msra.mxu1 %v118_v33 }
  0x18   :  { %v81_v14 = vsub.f32 1.0, %v80_v6 }
  0x19   :  { %v70_v25 = vrot.slane %v69_v23, 1  ;;  %v77_v26 = vrot.slane %v76_v24, 1 }
  0x1a   :  { %v82_v19 = vmul.f32 %v183_v1, %v81_v14 }
  0x1b   :  { %v71_v28 = vadd.f32 %v70_v25, %v69_v23  ;;  %v78_v29 = vadd.f32 %v77_v26, %v76_v24 }
  0x1c   :  { %v83_v22 = vadd.f32 %v183_v1, %v82_v19 }
  0x1e   :  { %v85_v27 = vsel %vm84_vm1, %v183_v1, %v83_v22 }
  0x1f   :  { %v86_v30 = vmul.f32 %v85_v27, %v71_v28  ;;  %v87_v31 = vmul.f32 %v85_v27, %v78_v29 }
  0x21   :  { %v95_v32 = vsel %vm94_vm2, %v87_v31, %v86_v30 }
  0x22   :  { %173 = vmatmul.msk.f32.vlgmr.msra.gmra.mxu0 %vm64_vm0, %v95_v32 }
  0x9f   :  { %v115_v34 = vpop.f32.mrf.mxu0 }
  0xa0   :  { %174 = vmatmul.msk.f32.vlgmr.msra.gmra.mxu1 %vm64_vm0, %v115_v34 }
 0x11d   :  { %v142_v35 = vpop.f32.mrf.mxu1 }
 0x11e   :  { %v146_v36 = vrot.slane %v142_v35, 1  ;;  %v147_v37 = vperm.slane %v142_v35, 0 }
 0x120   :  { %v148_v38 = vperm.slane %v146_v36, 0  ;;  %151 = vst.msk [vmem:[#allocation8] sm:$0xff] %vm64_vm0, %v147_v37 }
 0x122   :  { %152 = vst.msk [vmem:[#allocation8 + $0x8] sm:$0xff] %vm64_vm0, %v148_v38 }
 0x123   :  { %165 = dma.vmem_to_hbm [thread:$0]  %s158_s27, 256, %s160_s30, [#allocation4], %s287_s20, %s287_s20, %s288_s21  }
 0x124   :  { %284 = dma.done.wait [#allocation4], 256  }
 0x125   :  { %285 = vsyncadd [#allocation4], 4294967040 }
 0x126   :  { %170 = vsyncpa [#allocation3], 1 }
 0x127   :  { %171 = vsyncpa [#allocation6], 1 }
 0x128   :  { %172 = vsyncpa [#allocation4], 1 }

</bundles_post_ra>
